<compile_context>
chip_gen: v7x
topology: tpu7x:2x2x1
jax: 0.10.0
libtpu: 0.0.40
codegen_flags: <defaults>
</compile_context>

<pallas_src>
import math
from functools import partial

import jax
import jax.numpy as jnp
from jax.experimental import pallas as pl
from jax.experimental.pallas import tpu as pltpu

RANK = 8
LORA_ALPHA = 8
USE_RSLORA = True
SCALING = LORA_ALPHA / math.sqrt(RANK) if USE_RSLORA else LORA_ALPHA / RANK

LANE = 128  # lane width / MXU alignment target


def _round_up(n, m):
    return ((n + m - 1) // m) * m


def _pad2d(x, rows, cols):
    return jnp.pad(x, ((0, rows - x.shape[0]), (0, cols - x.shape[1])))


# ----------------------------------------------------------------------------
# Fused Pallas kernel: LoRALinear(fc1) -> ReLU -> LoRALinear(fc2)
# ----------------------------------------------------------------------------
def _fused_lora_mlp_kernel(x_ref,
                           w1_ref, b1_ref, a1_ref, bs1_ref,
                           w2_ref, b2_ref, a2_ref, bs2_ref,
                           o_ref):
    # TODO(synk): at real sizes, cast MXU inputs to bf16 here (keep f32
    # accumulation); kept f32 for this toy problem to hold 1e-4 tolerance.
    x = x_ref[...]                                               # [tm, Kp]

    # ---- fc1: x @ W1 + b1 + (x @ A1) @ (B1 * scaling) ----
    h = jnp.dot(x, w1_ref[...], preferred_element_type=jnp.float32)
    h += b1_ref[...]
    xa1 = jnp.dot(x, a1_ref[...], preferred_element_type=jnp.float32)   # [tm, R]
    h += jnp.dot(xa1, bs1_ref[...], preferred_element_type=jnp.float32)

    # ---- ReLU (on the f32 accumulator, in-register) ----
    h = jnp.maximum(h, 0.0)

    # ---- fc2: h @ W2 + b2 + (h @ A2) @ (B2 * scaling) ----
    y = jnp.dot(h, w2_ref[...], preferred_element_type=jnp.float32)
    y += b2_ref[...]
    ha2 = jnp.dot(h, a2_ref[...], preferred_element_type=jnp.float32)   # [tm, R]
    y += jnp.dot(ha2, bs2_ref[...], preferred_element_type=jnp.float32)

    o_ref[...] = y.astype(o_ref.dtype)


def _prep_layer(p, in_pad, out_pad):
    """Pre-transpose / pre-scale / lane-pad one LoRALinear's parameters."""
    w_t = _pad2d(p["w"].T, in_pad, out_pad)            # [in_pad, out_pad]
    b = _pad2d(p["b"], 1, out_pad)                     # [1, out_pad]
    a = _pad2d(p["A"], in_pad, p["A"].shape[1])        # [in_pad, R]
    b_scaled = _pad2d(p["B"] * SCALING, p["B"].shape[0], out_pad)  # [R, out_pad]
    return w_t, b, a, b_scaled


def fused_lora_mlp(x2d, params):
    """x2d: [M, d_in] f32 -> [M, d_out] f32 via fused fc1 -> ReLU -> fc2."""
    M, d_in = x2d.shape
    d_hidden = params["fc1"]["w"].shape[0]
    d_out = params["fc2"]["w"].shape[0]
    R = params["fc1"]["A"].shape[1]

    kp = _round_up(d_in, LANE)
    hp = _round_up(d_hidden, LANE)
    np_ = _round_up(d_out, LANE)

    # Row tiling: one big tile if M is small, else 128-row tiles (pad ragged).
    tm = _round_up(M, 8) if M <= LANE else LANE
    mp = _round_up(M, tm)

    x_p = _pad2d(x2d, mp, kp)
    w1, b1, a1, bs1 = _prep_layer(params["fc1"], kp, hp)
    w2, b2, a2, bs2 = _prep_layer(params["fc2"], hp, np_)

    out_p = pl.pallas_call(
        _fused_lora_mlp_kernel,
        out_shape=jax.ShapeDtypeStruct((mp, np_), x2d.dtype),
        grid_spec=pltpu.PrefetchScalarGridSpec(
            num_scalar_prefetch=0,
            grid=(mp // tm,),
            in_specs=[
                pl.BlockSpec((tm, kp), lambda i: (i, 0)),    # x rows tile
                pl.BlockSpec((kp, hp), lambda i: (0, 0)),    # W1^T (resident)
                pl.BlockSpec((1, hp), lambda i: (0, 0)),     # b1
                pl.BlockSpec((kp, R), lambda i: (0, 0)),     # A1
                pl.BlockSpec((R, hp), lambda i: (0, 0)),     # B1 * scaling
                pl.BlockSpec((hp, np_), lambda i: (0, 0)),   # W2^T (resident)
                pl.BlockSpec((1, np_), lambda i: (0, 0)),    # b2
                pl.BlockSpec((hp, R), lambda i: (0, 0)),     # A2
                pl.BlockSpec((R, np_), lambda i: (0, 0)),    # B2 * scaling
            ],
            out_specs=pl.BlockSpec((tm, np_), lambda i: (i, 0)),
        ),
        compiler_params=pltpu.CompilerParams(
            dimension_semantics=("parallel",)),
    )(x_p, w1, b1, a1, bs1, w2, b2, a2, bs2)

    return out_p[:M, :d_out]


# ----------------------------------------------------------------------------
# LoraModel.forward equivalent
# ----------------------------------------------------------------------------
@jax.jit
def lora_model_forward(params, x):
    """x: [B, S, d_in] float32 -> [B, S, d_out]."""
    B, S, H = x.shape
    h = x.reshape(B * S, H)
    y = fused_lora_mlp(h, params)
    return y.reshape(B, S, -1)


def lora_model_forward_ref(params, x):
    """Pure-JAX reference with the original (unfactored) op ordering."""
    B, S, H = x.shape
    h = x.reshape(B * S, H)
    for name in ("fc1", "fc2"):
        p = params[name]
        orig = h @ p["w"].T + p["b"]
        lora_mult = (p["A"] @ p["B"]) * SCALING
        h = orig + h @ lora_mult
        if name == "fc1":
            h = jnp.maximum(h, 0.0)
    return h.reshape(B, S, -1)


# ----------------------------------------------------------------------------
# Deterministic parameter init (shapes dictated by the module's __init__)
# ----------------------------------------------------------------------------
def init_lora_linear_params(key, in_features, out_features, rank):
    kw, kb, ka, kbm = jax.random.split(key, 4)
    bound = 1.0 / math.sqrt(in_features)
    w = jax.random.uniform(kw, (out_features, in_features), jnp.float32,
                           -bound, bound)                       # nn.Linear.weight
    b = jax.random.uniform(kb, (1, out_features), jnp.float32, -bound, bound)
    a_bound = math.sqrt(6.0 / ((1.0 + 5.0) * in_features))      # kaiming a=sqrt(5)
    A = jax.random.uniform(ka, (in_features, rank), jnp.float32,
                           -a_bound, a_bound)                   # lora_A
    # lora_B is zeros in the torch __init__; use small non-zero values here so
    # the low-rank path actually contributes and is exercised by the kernel.
    B = 0.02 * jax.random.normal(kbm, (rank, out_features), jnp.float32)
    return {"w": w, "b": b, "A": A, "B": B}


if __name__ == "__main__":
    key = jax.random.PRNGKey(0)
    k_x, k1, k2 = jax.random.split(key, 3)

    batch, seq, d_in, d_hidden, d_out = 2, 8, 32, 64, 32

    params = {
        "fc1": init_lora_linear_params(k1, d_in, d_hidden, RANK),
        "fc2": init_lora_linear_params(k2, d_hidden, d_out, RANK),
    }
    x = jax.random.normal(k_x, (batch, seq, d_in), jnp.float32)

    out = lora_model_forward(params, x)
    out = jax.block_until_ready(out)

    ref = lora_model_forward_ref(params, x)
    assert out.shape == (batch, seq, d_out)
    assert jnp.allclose(out, ref, atol=1e-4, rtol=1e-4), "mismatch vs reference"

    # TODO(synk): LoRAEmbedding path (gather + max_norm renorm side-effect) is
    # not exercised because the synthetic base model only contains Linear layers.
    print("KERNEL_OK")
</pallas_src>

<mosaic_0001>
module attributes {stable_mosaic.version = 11 : i64} {
  func.func @_fused_lora_mlp_kernel(%arg0: i32, %arg1: memref<16x128xf32, #tpu.memory_space<vmem>>, %arg2: memref<128x128xf32, #tpu.memory_space<vmem>>, %arg3: memref<1x128xf32, #tpu.memory_space<vmem>>, %arg4: memref<128x8xf32, #tpu.memory_space<vmem>>, %arg5: memref<8x128xf32, #tpu.memory_space<vmem>>, %arg6: memref<128x128xf32, #tpu.memory_space<vmem>>, %arg7: memref<1x128xf32, #tpu.memory_space<vmem>>, %arg8: memref<128x8xf32, #tpu.memory_space<vmem>>, %arg9: memref<8x128xf32, #tpu.memory_space<vmem>>, %arg10: memref<16x128xf32, #tpu.memory_space<vmem>>) attributes {dimension_semantics = [#tpu.dimension_semantics<parallel>], iteration_bounds = array<i64: 1>, scalar_prefetch = 0 : i64, scratch_operands = 0 : i64, tpu.core_type = #tpu.core_type<tc>, window_params = [{transform_indices = @transform_0, window_bounds = array<i64: 16, 128>}, {pipeline_mode = #tpu.pipeline_mode<synchronous>, transform_indices = @transform_1, window_bounds = array<i64: 128, 128>}, {pipeline_mode = #tpu.pipeline_mode<synchronous>, transform_indices = @transform_2, window_bounds = array<i64: 1, 128>}, {pipeline_mode = #tpu.pipeline_mode<synchronous>, transform_indices = @transform_3, window_bounds = array<i64: 128, 8>}, {pipeline_mode = #tpu.pipeline_mode<synchronous>, transform_indices = @transform_4, window_bounds = array<i64: 8, 128>}, {pipeline_mode = #tpu.pipeline_mode<synchronous>, transform_indices = @transform_5, window_bounds = array<i64: 128, 128>}, {pipeline_mode = #tpu.pipeline_mode<synchronous>, transform_indices = @transform_6, window_bounds = array<i64: 1, 128>}, {pipeline_mode = #tpu.pipeline_mode<synchronous>, transform_indices = @transform_7, window_bounds = array<i64: 128, 8>}, {pipeline_mode = #tpu.pipeline_mode<synchronous>, transform_indices = @transform_8, window_bounds = array<i64: 8, 128>}, {transform_indices = @transform_9, window_bounds = array<i64: 16, 128>}]} {
    %c0 = arith.constant 0 : index
    %c0_0 = arith.constant 0 : index
    %0 = vector.load %arg1[%c0, %c0_0] : memref<16x128xf32, #tpu.memory_space<vmem>>, vector<16x128xf32>
    %c0_1 = arith.constant 0 : index
    %c0_2 = arith.constant 0 : index
    %1 = vector.load %arg2[%c0_1, %c0_2] : memref<128x128xf32, #tpu.memory_space<vmem>>, vector<128x128xf32>
    %cst = arith.constant dense<0.000000e+00> : vector<16x128xf32>
    %2 = tpu.matmul %0, %1, %cst {dimension_numbers = #tpu.dot_dimension_numbers<[1], [0], [0], [1], [0, 0, 1, 1], [], []>} : vector<16x128xf32>, vector<128x128xf32>, vector<16x128xf32> -> vector<16x128xf32>
    %c0_3 = arith.constant 0 : index
    %c0_4 = arith.constant 0 : index
    %3 = vector.load %arg3[%c0_3, %c0_4] : memref<1x128xf32, #tpu.memory_space<vmem>>, vector<1x128xf32>
    %4 = vector.broadcast %3 : vector<1x128xf32> to vector<16x128xf32>
    %5 = arith.addf %2, %4 : vector<16x128xf32>
    %c0_5 = arith.constant 0 : index
    %c0_6 = arith.constant 0 : index
    %6 = vector.load %arg4[%c0_5, %c0_6] : memref<128x8xf32, #tpu.memory_space<vmem>>, vector<128x8xf32>
    %cst_7 = arith.constant dense<0.000000e+00> : vector<16x8xf32>
    %7 = tpu.matmul %0, %6, %cst_7 {dimension_numbers = #tpu.dot_dimension_numbers<[1], [0], [0], [1], [0, 0, 1, 1], [], []>} : vector<16x128xf32>, vector<128x8xf32>, vector<16x8xf32> -> vector<16x8xf32>
    %c0_8 = arith.constant 0 : index
    %c0_9 = arith.constant 0 : index
    %8 = vector.load %arg5[%c0_8, %c0_9] : memref<8x128xf32, #tpu.memory_space<vmem>>, vector<8x128xf32>
    %cst_10 = arith.constant dense<0.000000e+00> : vector<16x128xf32>
    %9 = tpu.matmul %7, %8, %cst_10 {dimension_numbers = #tpu.dot_dimension_numbers<[1], [0], [0], [1], [0, 0, 1, 1], [], []>} : vector<16x8xf32>, vector<8x128xf32>, vector<16x128xf32> -> vector<16x128xf32>
    %10 = arith.addf %5, %9 : vector<16x128xf32>
    %cst_11 = arith.constant 0.000000e+00 : f32
    %11 = vector.broadcast %cst_11 : f32 to vector<16x128xf32>
    %12 = arith.maximumf %10, %11 : vector<16x128xf32>
    %c0_12 = arith.constant 0 : index
    %c0_13 = arith.constant 0 : index
    %13 = vector.load %arg6[%c0_12, %c0_13] : memref<128x128xf32, #tpu.memory_space<vmem>>, vector<128x128xf32>
    %cst_14 = arith.constant dense<0.000000e+00> : vector<16x128xf32>
    %14 = tpu.matmul %12, %13, %cst_14 {dimension_numbers = #tpu.dot_dimension_numbers<[1], [0], [0], [1], [0, 0, 1, 1], [], []>} : vector<16x128xf32>, vector<128x128xf32>, vector<16x128xf32> -> vector<16x128xf32>
    %c0_15 = arith.constant 0 : index
    %c0_16 = arith.constant 0 : index
    %15 = vector.load %arg7[%c0_15, %c0_16] : memref<1x128xf32, #tpu.memory_space<vmem>>, vector<1x128xf32>
    %16 = vector.broadcast %15 : vector<1x128xf32> to vector<16x128xf32>
    %17 = arith.addf %14, %16 : vector<16x128xf32>
    %c0_17 = arith.constant 0 : index
    %c0_18 = arith.constant 0 : index
    %18 = vector.load %arg8[%c0_17, %c0_18] : memref<128x8xf32, #tpu.memory_space<vmem>>, vector<128x8xf32>
    %cst_19 = arith.constant dense<0.000000e+00> : vector<16x8xf32>
    %19 = tpu.matmul %12, %18, %cst_19 {dimension_numbers = #tpu.dot_dimension_numbers<[1], [0], [0], [1], [0, 0, 1, 1], [], []>} : vector<16x128xf32>, vector<128x8xf32>, vector<16x8xf32> -> vector<16x8xf32>
    %c0_20 = arith.constant 0 : index
    %c0_21 = arith.constant 0 : index
    %20 = vector.load %arg9[%c0_20, %c0_21] : memref<8x128xf32, #tpu.memory_space<vmem>>, vector<8x128xf32>
    %cst_22 = arith.constant dense<0.000000e+00> : vector<16x128xf32>
    %21 = tpu.matmul %19, %20, %cst_22 {dimension_numbers = #tpu.dot_dimension_numbers<[1], [0], [0], [1], [0, 0, 1, 1], [], []>} : vector<16x8xf32>, vector<8x128xf32>, vector<16x128xf32> -> vector<16x128xf32>
    %22 = arith.addf %17, %21 : vector<16x128xf32>
    %c0_23 = arith.constant 0 : index
    %c0_24 = arith.constant 0 : index
    %23 = vector.load %arg10[%c0_23, %c0_24] : memref<16x128xf32, #tpu.memory_space<vmem>>, vector<16x128xf32>
    tpu.vector_store %arg10[%c0_23, %c0_24], %22 {strides = array<i32>} : memref<16x128xf32, #tpu.memory_space<vmem>>, vector<16x128xf32>,
    return
  }
  func.func @transform_0(%arg0: i32) -> (i32, i32) {
    %c0_i32 = arith.constant 0 : i32
    %c0_i32_0 = arith.constant 0 : i32
    return %arg0, %c0_i32 : i32, i32
  }
  func.func @transform_1(%arg0: i32) -> (i32, i32) {
    %c0_i32 = arith.constant 0 : i32
    %c0_i32_0 = arith.constant 0 : i32
    %c0_i32_1 = arith.constant 0 : i32
    return %c0_i32, %c0_i32_0 : i32, i32
  }
  func.func @transform_2(%arg0: i32) -> (i32, i32) {
    %c0_i32 = arith.constant 0 : i32
    %c0_i32_0 = arith.constant 0 : i32
    %c0_i32_1 = arith.constant 0 : i32
    return %c0_i32, %c0_i32_0 : i32, i32
  }
  func.func @transform_3(%arg0: i32) -> (i32, i32) {
    %c0_i32 = arith.constant 0 : i32
    %c0_i32_0 = arith.constant 0 : i32
    %c0_i32_1 = arith.constant 0 : i32
    return %c0_i32, %c0_i32_0 : i32, i32
  }
  func.func @transform_4(%arg0: i32) -> (i32, i32) {
    %c0_i32 = arith.constant 0 : i32
    %c0_i32_0 = arith.constant 0 : i32
    %c0_i32_1 = arith.constant 0 : i32
    return %c0_i32, %c0_i32_0 : i32, i32
  }
  func.func @transform_5(%arg0: i32) -> (i32, i32) {
    %c0_i32 = arith.constant 0 : i32
    %c0_i32_0 = arith.constant 0 : i32
    %c0_i32_1 = arith.constant 0 : i32
    return %c0_i32, %c0_i32_0 : i32, i32
  }
  func.func @transform_6(%arg0: i32) -> (i32, i32) {
    %c0_i32 = arith.constant 0 : i32
    %c0_i32_0 = arith.constant 0 : i32
    %c0_i32_1 = arith.constant 0 : i32
    return %c0_i32, %c0_i32_0 : i32, i32
  }
  func.func @transform_7(%arg0: i32) -> (i32, i32) {
    %c0_i32 = arith.constant 0 : i32
    %c0_i32_0 = arith.constant 0 : i32
    %c0_i32_1 = arith.constant 0 : i32
    return %c0_i32, %c0_i32_0 : i32, i32
  }
  func.func @transform_8(%arg0: i32) -> (i32, i32) {
    %c0_i32 = arith.constant 0 : i32
    %c0_i32_0 = arith.constant 0 : i32
    %c0_i32_1 = arith.constant 0 : i32
    return %c0_i32, %c0_i32_0 : i32, i32
  }
  func.func @transform_9(%arg0: i32) -> (i32, i32) {
    %c0_i32 = arith.constant 0 : i32
    %c0_i32_0 = arith.constant 0 : i32
    return %arg0, %c0_i32 : i32, i32
  }
}

</mosaic_0001>

<bundles_post_ra>
// kernel: lora_model_forward.1
= control target key start
LH: loop header
LB: loop body
LE: loop exit
PB: predicated region body
PF: predicated region fallthrough
CT: control target
= control target key end

     0   :  { %vm224_vm0 = vcmask 64512   ;;  %s1229_s3 = inlined_call_operand.vmem [shape: f32[128,8], index: 3, kind: input, shape index: {}]   ;;  %s1230_s0 = inlined_call_operand.vmem [shape: f32[16,128], index: 0, kind: input, shape index: {}]   ;;  %s1231_s1 = inlined_call_operand.vmem [shape: f32[128,128], index: 1, kind: input, shape index: {}]   ;;  %s1232_s4 = inlined_call_operand.vmem [shape: f32[8,128], index: 4, kind: input, shape index: {}]   ;;  %s1233_s5 = inlined_call_operand.vmem [shape: f32[128,128], index: 5, kind: input, shape index: {}]   ;;  %s1234_s7 = inlined_call_operand.vmem [shape: f32[128,8], index: 7, kind: input, shape index: {}]   ;;  %s1235_s8 = inlined_call_operand.vmem [shape: f32[8,128], index: 8, kind: input, shape index: {}]   ;;  %s1236_s2 = inlined_call_operand.vmem [shape: f32[1,128], index: 2, kind: input, shape index: {}]   ;;  %s1237_s6 = inlined_call_operand.vmem [shape: f32[1,128], index: 6, kind: input, shape index: {}]   ;;  %s1238_s9 = inlined_call_operand.vmem [shape: f32[16,128], index: 9, kind: output, shape index: {}]  }
   0x1   :  { %v132_v0 = vld [vmem:[%s1229_s3] sm:$0xff]  ;;  %v133_v1 = vld [vmem:[%s1229_s3 + $0x8] sm:$0xff]  ;;  %v134_v2 = vld [vmem:[%s1229_s3 + $0x10] sm:$0xff] }
   0x2   :  { %v855_v3 = vpack.c.bf16 %v133_v1, %v132_v0  ;;  %v135_v4 = vld [vmem:[%s1229_s3 + $0x18] sm:$0xff]  ;;  %v136_v6 = vld [vmem:[%s1229_s3 + $0x20] sm:$0xff]  ;;  %v137_v7 = vld [vmem:[%s1229_s3 + $0x28] sm:$0xff] }
   0x3   :  { %v859_v5 = vpack.c.bf16 %v135_v4, %v134_v2  ;;  %v863_v8 = vpack.c.bf16 %v137_v7, %v136_v6  ;;  %v138_v9 = vld [vmem:[%s1229_s3 + $0x30] sm:$0xff]  ;;  %v139_v10 = vld [vmem:[%s1229_s3 + $0x38] sm:$0xff]  ;;  %v32_v11 = vld [vmem:[%s1230_s0] sm:$0xff] }
   0x4   :  { %856 = vmatprep.subr.bf16.mxu1 %v855_v3  ;;  %740 = vmatprep.mubr.f32.mxu1 %v32_v11  ;;  %v34_v12 = vld [vmem:[%s1231_s1] sm:$0xff]  ;;  %v35_v13 = vld [vmem:[%s1231_s1 + $0x8] sm:$0xff]  ;;  %v36_v14 = vld [vmem:[%s1231_s1 + $0x10] sm:$0xff]  ;;  %v867_v20 = vpack.c.bf16 %v139_v10, %v138_v9 }
   0x5   :  { %858 = vmatpush3.bf16.msra.mxu1 %v855_v3  ;;  %705 = vmatprep.mubr.f32.mxu0 %v32_v11  ;;  %v823_v15 = vpack.c.bf16 %v35_v13, %v34_v12  ;;  %v37_v16 = vld [vmem:[%s1231_s1 + $0x18] sm:$0xff]  ;;  %v38_v18 = vld [vmem:[%s1231_s1 + $0x20] sm:$0xff]  ;;  %v39_v19 = vld [vmem:[%s1231_s1 + $0x28] sm:$0xff] }
   0x6   :  { %860 = vmatprep.subr.bf16.mxu1 %v859_v5  ;;  %v827_v17 = vpack.c.bf16 %v37_v16, %v36_v14  ;;  %v140_v21 = vld [vmem:[%s1229_s3 + $0x40] sm:$0xff]  ;;  %v141_v22 = vld [vmem:[%s1229_s3 + $0x48] sm:$0xff]  ;;  %v831_v23 = vpack.c.bf16 %v39_v19, %v38_v18  ;;  %v40_v24 = vld [vmem:[%s1231_s1 + $0x30] sm:$0xff] }
   0x7   :  { %824 = vmatprep.subr.bf16.mxu0 %v823_v15  ;;  %v41_v25 = vld [vmem:[%s1231_s1 + $0x38] sm:$0xff]  ;;  %v871_v26 = vpack.c.bf16 %v141_v22, %v140_v21  ;;  %v142_v27 = vld [vmem:[%s1229_s3 + $0x50] sm:$0xff]  ;;  %v42_v30 = vld [vmem:[%s1231_s1 + $0x40] sm:$0xff] }
   0x8   :  { %826 = vmatpush3.bf16.msra.mxu0 %v823_v15  ;;  %v143_v28 = vld [vmem:[%s1229_s3 + $0x58] sm:$0xff]  ;;  %v835_v29 = vpack.c.bf16 %v41_v25, %v40_v24  ;;  %v43_v31 = vld [vmem:[%s1231_s1 + $0x48] sm:$0xff]  ;;  %v144_v33 = vld [vmem:[%s1229_s3 + $0x60] sm:$0xff] }
   0x9   :  { %862 = vmatpush3.bf16.msra.mxu1 %v859_v5  ;;  %828 = vmatprep.subr.bf16.mxu0 %v827_v17  ;;  %v875_v32 = vpack.c.bf16 %v143_v28, %v142_v27  ;;  %v145_v34 = vld [vmem:[%s1229_s3 + $0x68] sm:$0xff]  ;;  %v839_v35 = vpack.c.bf16 %v43_v31, %v42_v30  ;;  %v44_v36 = vld [vmem:[%s1231_s1 + $0x50] sm:$0xff]  ;;  %v45_v37 = vld [vmem:[%s1231_s1 + $0x58] sm:$0xff] }
   0xa   :  { %864 = vmatprep.subr.bf16.mxu1 %v863_v8  ;;  %v879_v38 = vpack.c.bf16 %v145_v34, %v144_v33  ;;  %v146_v39 = vld [vmem:[%s1229_s3 + $0x70] sm:$0xff]  ;;  %v147_v40 = vld [vmem:[%s1229_s3 + $0x78] sm:$0xff]  ;;  %v843_v41 = vpack.c.bf16 %v45_v37, %v44_v36  ;;  %v46_v42 = vld [vmem:[%s1231_s1 + $0x60] sm:$0xff] }
   0xb   :  { %v47_v43 = vld [vmem:[%s1231_s1 + $0x68] sm:$0xff]  ;;  %v883_v44 = vpack.c.bf16 %v147_v40, %v146_v39  ;;  %v48_v46 = vld [vmem:[%s1231_s1 + $0x70] sm:$0xff]  ;;  %v49_v47 = vld [vmem:[%s1231_s1 + $0x78] sm:$0xff] }
   0xc   :  { %830 = vmatpush3.bf16.msra.mxu0 %v827_v17  ;;  %v847_v45 = vpack.c.bf16 %v47_v43, %v46_v42  ;;  %v851_v48 = vpack.c.bf16 %v49_v47, %v48_v46  ;;  %v33_v49 = vld [vmem:[%s1230_s0 + $0x8] sm:$0xff]  ;;  %v223_v50 = vld [vmem:[%s1232_s4] sm:$0xff]  ;;  %v312_v56 = vld [vmem:[%s1233_s5 + $0x10] sm:$0xff] }
   0xd   :  { %866 = vmatpush3.bf16.msra.mxu1 %v863_v8  ;;  %832 = vmatprep.subr.bf16.mxu0 %v831_v23  ;;  %v310_v51 = vld [vmem:[%s1233_s5] sm:$0xff]  ;;  %v311_v52 = vld [vmem:[%s1233_s5 + $0x8] sm:$0xff]  ;;  %v313_v57 = vld [vmem:[%s1233_s5 + $0x18] sm:$0xff] }
   0xe   :  { %868 = vmatprep.subr.bf16.mxu1 %v867_v20  ;;  %v408_v53 = vld [vmem:[%s1234_s7] sm:$0xff]  ;;  %v887_v54 = vpack.c.bf16 %v311_v52, %v310_v51  ;;  %v409_v55 = vld [vmem:[%s1234_s7 + $0x8] sm:$0xff]  ;;  %v891_v59 = vpack.c.bf16 %v313_v57, %v312_v56  ;;  %v316_v63 = vld [vmem:[%s1233_s5 + $0x30] sm:$0xff] }
   0xf   :  { %v919_v58 = vpack.c.bf16 %v409_v55, %v408_v53  ;;  %v314_v60 = vld [vmem:[%s1233_s5 + $0x20] sm:$0xff]  ;;  %v315_v61 = vld [vmem:[%s1233_s5 + $0x28] sm:$0xff]  ;;  %v317_v0 = vld [vmem:[%s1233_s5 + $0x38] sm:$0xff] }
  0x10   :  { %834 = vmatpush3.bf16.msra.mxu0 %v831_v23  ;;  %v895_v62 = vpack.c.bf16 %v315_v61, %v314_v60  ;;  %v899_v1 = vpack.c.bf16 %v317_v0, %v316_v63  ;;  %v318_v2 = vld [vmem:[%s1233_s5 + $0x40] sm:$0xff]  ;;  %v319_v3 = vld [vmem:[%s1233_s5 + $0x48] sm:$0xff]  ;;  %v320_v5 = vld [vmem:[%s1233_s5 + $0x50] sm:$0xff] }
  0x11   :  { %870 = vmatpush3.bf16.msra.mxu1 %v867_v20  ;;  %836 = vmatprep.subr.bf16.mxu0 %v835_v29  ;;  %v903_v4 = vpack.c.bf16 %v319_v3, %v318_v2  ;;  %v321_v6 = vld [vmem:[%s1233_s5 + $0x58] sm:$0xff]  ;;  %v322_v8 = vld [vmem:[%s1233_s5 + $0x60] sm:$0xff]  ;;  %v323_v9 = vld [vmem:[%s1233_s5 + $0x68] sm:$0xff] }
  0x12   :  { %872 = vmatprep.subr.bf16.mxu1 %v871_v26  ;;  %v907_v7 = vpack.c.bf16 %v321_v6, %v320_v5  ;;  %v911_v10 = vpack.c.bf16 %v323_v9, %v322_v8  ;;  %v410_v11 = vld [vmem:[%s1234_s7 + $0x10] sm:$0xff]  ;;  %v411_v12 = vld [vmem:[%s1234_s7 + $0x18] sm:$0xff]  ;;  %v412_v16 = vld [vmem:[%s1234_s7 + $0x20] sm:$0xff] }
  0x13   :  { %v923_v15 = vpack.c.bf16 %v411_v12, %v410_v11  ;;  %v413_v17 = vld [vmem:[%s1234_s7 + $0x28] sm:$0xff]  ;;  %v414_v19 = vld [vmem:[%s1234_s7 + $0x30] sm:$0xff]  ;;  %v415_v20 = vld [vmem:[%s1234_s7 + $0x38] sm:$0xff] }
  0x14   :  { %838 = vmatpush3.bf16.msra.mxu0 %v835_v29  ;;  %v927_v18 = vpack.c.bf16 %v413_v17, %v412_v16  ;;  %v931_v21 = vpack.c.bf16 %v415_v20, %v414_v19  ;;  %v416_v22 = vld [vmem:[%s1234_s7 + $0x40] sm:$0xff]  ;;  %v417_v23 = vld [vmem:[%s1234_s7 + $0x48] sm:$0xff]  ;;  %v418_v25 = vld [vmem:[%s1234_s7 + $0x50] sm:$0xff] }
  0x15   :  { %874 = vmatpush3.bf16.msra.mxu1 %v871_v26  ;;  %840 = vmatprep.subr.bf16.mxu0 %v839_v35  ;;  %v935_v24 = vpack.c.bf16 %v417_v23, %v416_v22  ;;  %v419_v26 = vld [vmem:[%s1234_s7 + $0x58] sm:$0xff]  ;;  %v420_v28 = vld [vmem:[%s1234_s7 + $0x60] sm:$0xff]  ;;  %v421_v29 = vld [vmem:[%s1234_s7 + $0x68] sm:$0xff] }
  0x16   :  { %876 = vmatprep.subr.bf16.mxu1 %v875_v32  ;;  %v939_v27 = vpack.c.bf16 %v419_v26, %v418_v25  ;;  %v943_v30 = vpack.c.bf16 %v421_v29, %v420_v28  ;;  %v324_v31 = vld [vmem:[%s1233_s5 + $0x70] sm:$0xff]  ;;  %v499_v37 = vld [vmem:[%s1235_s8] sm:$0xff] }
  0x17   :  { %v422_v33 = vld [vmem:[%s1234_s7 + $0x70] sm:$0xff]  ;;  %v592_v47 = vld [vmem:[%s1237_s6] ss:$0 sm:$0xff] }
  0x18   :  { %842 = vmatpush3.bf16.msra.mxu0 %v839_v35  ;;  %v423_v35 = vld [vmem:[%s1234_s7 + $0x78] sm:$0xff] }
  0x19   :  { %878 = vmatpush3.bf16.msra.mxu1 %v875_v32  ;;  %844 = vmatprep.subr.bf16.mxu0 %v843_v41  ;;  %v325_v32 = vld [vmem:[%s1233_s5 + $0x78] sm:$0xff]  ;;  %v947_v36 = vpack.c.bf16 %v423_v35, %v422_v33 }
  0x1a   :  { %880 = vmatprep.subr.bf16.mxu1 %v879_v38  ;;  %v915_v34 = vpack.c.bf16 %v325_v32, %v324_v31 }
  0x1c   :  { %846 = vmatpush3.bf16.msra.mxu0 %v843_v41 }
  0x1d   :  { %882 = vmatpush3.bf16.msra.mxu1 %v879_v38  ;;  %848 = vmatprep.subr.bf16.mxu0 %v847_v45  ;;  %v589_v38 = vld [vmem:[%s1236_s2] ss:$0 sm:$0xff] }
  0x1e   :  { %884 = vmatprep.subr.bf16.mxu1 %v883_v44 }
  0x20   :  { %850 = vmatpush3.bf16.msra.mxu0 %v847_v45 }
  0x21   :  { %886 = vmatpush3.bf16.msra.mxu1 %v883_v44  ;;  %852 = vmatprep.subr.bf16.mxu0 %v851_v48 }
  0x22   :  { %888 = vmatprep.subr.bf16.mxu1 %v887_v54 }
  0x24   :  { %741 = vmatmul.mubr.f32.vlgmr.msra.gmra.mrb[0].mxu1 %v33_v49  ;;  %854 = vmatpush3.bf16.msra.mxu0 %v851_v48 }
  0x25   :  { %743 = vmatprep.subr.mxu0 %v223_v50  ;;  %890 = vmatpush3.bf16.msra.mxu1 %v887_v54 }
  0x26   :  { %892 = vmatprep.subr.bf16.mxu1 %v891_v59 }
  0x27   :  { %706 = vmatmul.mubr.f32.vlgmr.msra.gmra.mrb[0].mxu0 %v33_v49 }
  0x28   :  { %744 = vmatpush3.msra.mxu0 %v223_v50 }
  0x29   :  { %920 = vmatprep.subr.bf16.mxu0 %v919_v58  ;;  %894 = vmatpush3.bf16.msra.mxu1 %v891_v59 }
  0x2a   :  { %896 = vmatprep.subr.bf16.mxu1 %v895_v62 }
  0x2d   :  { %898 = vmatpush3.bf16.msra.mxu1 %v895_v62 }
  0x2e   :  { %900 = vmatprep.subr.bf16.mxu1 %v899_v1 }
  0x31   :  { %902 = vmatpush3.bf16.msra.mxu1 %v899_v1 }
  0x32   :  { %904 = vmatprep.subr.bf16.mxu1 %v903_v4 }
  0x35   :  { %906 = vmatpush3.bf16.msra.mxu1 %v903_v4 }
  0x36   :  { %908 = vmatprep.subr.bf16.mxu1 %v907_v7 }
  0x39   :  { %910 = vmatpush3.bf16.msra.mxu1 %v907_v7 }
  0x3a   :  { %912 = vmatprep.subr.bf16.mxu1 %v911_v10 }
  0x3d   :  { %914 = vmatpush3.bf16.msra.mxu1 %v911_v10 }
  0x3e   :  { %916 = vmatprep.subr.bf16.mxu1 %v915_v34 }
  0x41   :  { %918 = vmatpush3.bf16.msra.mxu1 %v915_v34 }
  0x42   :  { %818 = vmatprep.subr.mxu1 %v499_v37 }
  0xf7   :  { %v742_v13 = vpop.f32.mrb[0].mxu1 }
  0xf8   :  { %v214_v14 = vpop.f32.mrb[1].mxu1 }
  0xf9   :  { %745 = vmatprep.mubr.msk.f32.mxu0 %vm224_vm0, %v214_v14 }
  0xfa   :  { %746 = vmatmul.mubr.msk.f32.vlgmr.msra.gmra.mrb[0].mxu0 %vm224_vm0, %v742_v13 }
  0xfb   :  { %922 = vmatpush3.bf16.msra.mxu0 %v919_v58 }
  0xfc   :  { %924 = vmatprep.subr.bf16.mxu0 %v923_v15 }
  0xff   :  { %926 = vmatpush3.bf16.msra.mxu0 %v923_v15 }
 0x100   :  { %928 = vmatprep.subr.bf16.mxu0 %v927_v18 }
 0x103   :  { %930 = vmatpush3.bf16.msra.mxu0 %v927_v18 }
 0x104   :  { %932 = vmatprep.subr.bf16.mxu0 %v931_v21 }
 0x107   :  { %934 = vmatpush3.bf16.msra.mxu0 %v931_v21 }
 0x108   :  { %936 = vmatprep.subr.bf16.mxu0 %v935_v24 }
 0x10b   :  { %938 = vmatpush3.bf16.msra.mxu0 %v935_v24 }
 0x10c   :  { %940 = vmatprep.subr.bf16.mxu0 %v939_v27 }
 0x10f   :  { %942 = vmatpush3.bf16.msra.mxu0 %v939_v27 }
 0x110   :  { %944 = vmatprep.subr.bf16.mxu0 %v943_v30 }
 0x113   :  { %946 = vmatpush3.bf16.msra.mxu0 %v943_v30 }
 0x114   :  { %948 = vmatprep.subr.bf16.mxu0 %v947_v36 }
 0x117   :  { %950 = vmatpush3.bf16.msra.mxu0 %v947_v36 }
 0x1cd   :  { %v747_v39 = vpop.f32.mrb[0].mxu0 }
 0x1ce   :  { %v951_v40 = vadd.f32 %v747_v39, %v589_v38  ;;  %v297_v41 = vpop.f32.mrb[1].mxu0 }
 0x1cf   :  { %v952_v42 = vadd.f32 %v589_v38, %v297_v41 }
 0x1d0   :  { %v309_v44 = vmax.f32 %v951_v40, 0.0 }
 0x1d1   :  { %v308_v43 = vmax.f32 %v952_v42, 0.0 }
 0x1d3   :  { %780 = vmatprep.mubr.f32.mxu1 %v308_v43  ;;  %815 = vmatprep.mubr.f32.mxu0 %v308_v43 }
 0x1d4   :  { %781 = vmatmul.mubr.f32.vlgmr.msra.gmra.mrb[2].mxu1 %v309_v44  ;;  %816 = vmatmul.mubr.f32.vlgmr.msra.gmra.mrb[2].mxu0 %v309_v44 }
 0x1d5   :  { %819 = vmatpush3.msra.mxu1 %v499_v37 }
 0x2a7   :  { %v817_v45 = vpop.f32.mrb[2].mxu0 }
 0x2a8   :  { %v490_v46 = vpop.f32.mrb[3].mxu0 }
 0x2a9   :  { %820 = vmatprep.mubr.msk.f32.mxu1 %vm224_vm0, %v490_v46 }
 0x2aa   :  { %821 = vmatmul.mubr.msk.f32.vlgmr.msra.gmra.mrb[2].mxu1 %vm224_vm0, %v817_v45 }
 0x37d   :  { %v822_v48 = vpop.f32.mrb[2].mxu1 }
 0x37e   :  { %v953_v49 = vadd.f32 %v822_v48, %v592_v47  ;;  %v572_v50 = vpop.f32.mrb[3].mxu1 }
 0x37f   :  { %v954_v51 = vadd.f32 %v592_v47, %v572_v50 }
 0x380   :  { %584 = vst [vmem:[%s1238_s9 + $0x8] sm:$0xff] %v953_v49 }
 0x381   :  { %583 = vst [vmem:[%s1238_s9] sm:$0xff] %v954_v51 }

</bundles_post_ra>
